<compile_context>
chip_gen: v6e
topology: v6e:2x2x1
jax: 0.10.0
libtpu: 0.0.40
codegen_flags: <defaults>
</compile_context>

<pallas_src>
import jax
import jax.numpy as jnp
from jax.experimental import pallas as pl
from jax.experimental.pallas import tpu as pltpu


def _round_up(x, m):
    return ((x + m - 1) // m) * m


def critic_kernel(s_ref, a_ref, w1s_ref, w1a_ref, b1_ref, w2_ref, b2_ref,
                  w3_ref, b3_ref, o_ref):
    # Layer 1: fused "concat matmul":  [s | a] @ [w1_s ; w1_a] = s@w1_s + a@w1_a
    h1 = jnp.dot(s_ref[...], w1s_ref[...], preferred_element_type=jnp.float32)
    h1 = h1 + jnp.dot(a_ref[...], w1a_ref[...], preferred_element_type=jnp.float32)
    h1 = jnp.maximum(h1 + b1_ref[...], 0.0)
    # Layer 2: (block_b, H) @ (H, H) + (1, H) -> ReLU
    h2 = jnp.dot(h1, w2_ref[...], preferred_element_type=jnp.float32)
    h2 = jnp.maximum(h2 + b2_ref[...], 0.0)
    # Layer 3: out_features == 1 -> VPU multiply + lane reduction (w3 is (1, H)),
    # avoids an MXU matmul that would use a single output lane.
    v = jnp.sum(h2 * w3_ref[...], axis=-1, keepdims=True) + b3_ref[0, 0]
    o_ref[...] = v.astype(o_ref.dtype)


def critic_forward(state, action, params, *, block_b=512):
    """Fused Critic forward. state: (B, S), action: (B, A) -> value: (B, 1)."""
    w1_s, w1_a, b1, w2, b2, w3, b3 = params
    B, S = state.shape
    A = action.shape[1]
    H = w2.shape[0]

    # Batch tile: multiple of 8 sublanes, up to `block_b` rows; pad B if needed.
    block_b = min(block_b, _round_up(B, 8))
    Bp = _round_up(B, block_b)
    if Bp != B:
        pad = Bp - B
        state = jnp.pad(state, ((0, pad), (0, 0)))
        action = jnp.pad(action, ((0, pad), (0, 0)))

    grid = (Bp // block_b,)

    # Conservative VMEM budget: double-buffered batch tiles + resident weights
    # + activation headroom, clamped to v7x's 64 MiB physical VMEM.
    io_bytes = 4 * block_b * (S + A + 1)
    weight_bytes = 4 * (S * H + A * H + H * H + 3 * H + 1)
    act_bytes = 4 * block_b * 2 * H
    vmem_limit = int(min(max(4 * (2 * io_bytes + weight_bytes + act_bytes),
                             8 << 20), 64 << 20))

    const = lambda i: (0, 0)   # weights: resident across the batch grid
    batch = lambda i: (i, 0)   # activations / output: tiled over batch

    cost = pl.CostEstimate(
        flops=2 * Bp * ((S + A) * H + H * H + H),
        transcendentals=0,
        bytes_accessed=4 * (Bp * (S + A + 1) + S * H + A * H + H * H + 3 * H + 1),
    )

    out = pl.pallas_call(
        critic_kernel,
        out_shape=jax.ShapeDtypeStruct((Bp, 1), jnp.float32),
        grid=grid,
        in_specs=[
            pl.BlockSpec((block_b, S), batch),   # state tile
            pl.BlockSpec((block_b, A), batch),   # action tile
            pl.BlockSpec((S, H), const),         # w1_s (resident)
            pl.BlockSpec((A, H), const),         # w1_a (resident)
            pl.BlockSpec((1, H), const),         # b1
            pl.BlockSpec((H, H), const),         # w2
            pl.BlockSpec((1, H), const),         # b2
            pl.BlockSpec((1, H), const),         # w3 stored as (1, H)
            pl.BlockSpec((1, 1), const, memory_space=pltpu.MemorySpace.SMEM),  # b3
        ],
        out_specs=pl.BlockSpec((block_b, 1), batch),
        compiler_params=pltpu.CompilerParams(
            dimension_semantics=("parallel",),
            vmem_limit_bytes=vmem_limit,
        ),
        cost_estimate=cost,
    )(state, action, w1_s, w1_a, b1, w2, b2, w3, b3)

    return out[:B]


def init_critic_params(key, state_dim, action_dim, hidden_dim):
    """Deterministic uniform(-0.003, 0.003) init, matching weights_init_."""
    ks = jax.random.split(key, 6)
    u = lambda k, shape: jax.random.uniform(
        k, shape, dtype=jnp.float32, minval=-0.003, maxval=0.003
    )
    in_dim = state_dim + action_dim
    w1 = u(ks[0], (in_dim, hidden_dim))        # stored (in, out)
    b1 = u(ks[1], (1, hidden_dim))
    w2 = u(ks[2], (hidden_dim, hidden_dim))
    b2 = u(ks[3], (1, hidden_dim))
    w3 = u(ks[4], (1, hidden_dim))             # Linear(H, 1) weight stored as (1, H)
    b3 = u(ks[5], (1, 1))
    # Split layer-1 weight into state/action parts so the kernel never needs
    # a (B, S+A) concat materialized in HBM.
    w1_s, w1_a = w1[:state_dim], w1[state_dim:]
    return (w1_s, w1_a, b1, w2, b2, w3, b3)


def critic_ref(state, action, params):
    """Pure-JAX reference mirroring the PyTorch module exactly."""
    w1_s, w1_a, b1, w2, b2, w3, b3 = params
    x = jnp.concatenate([state, action], axis=1)
    w1 = jnp.concatenate([w1_s, w1_a], axis=0)
    h1 = jnp.maximum(x @ w1 + b1, 0.0)
    h2 = jnp.maximum(h1 @ w2 + b2, 0.0)
    return h2 @ w3.T + b3


if __name__ == "__main__":
    B, S, A, H = 8, 16, 8, 32  # batch, state_dim, action_dim, hidden_dim

    key = jax.random.PRNGKey(0)
    k_state, k_action, k_params = jax.random.split(key, 3)

    state = jax.random.normal(k_state, (B, S), dtype=jnp.float32)
    action = jax.random.normal(k_action, (B, A), dtype=jnp.float32)
    params = init_critic_params(k_params, S, A, H)

    value = critic_forward(state, action, params)
    value = jax.block_until_ready(value)

    expected = critic_ref(state, action, params)
    assert value.shape == (B, 1), value.shape
    assert jnp.allclose(value, expected, atol=1e-5, rtol=1e-5), (
        "mismatch vs pure-JAX reference"
    )

    print("KERNEL_OK")
</pallas_src>

<mosaic_0001>
module attributes {stable_mosaic.version = 11 : i64} {
  func.func @critic_kernel(%arg0: i32, %arg1: memref<8x16xf32, #tpu.memory_space<vmem>>, %arg2: memref<8x8xf32, #tpu.memory_space<vmem>>, %arg3: memref<16x32xf32, #tpu.memory_space<vmem>>, %arg4: memref<8x32xf32, #tpu.memory_space<vmem>>, %arg5: memref<1x32xf32, #tpu.memory_space<vmem>>, %arg6: memref<32x32xf32, #tpu.memory_space<vmem>>, %arg7: memref<1x32xf32, #tpu.memory_space<vmem>>, %arg8: memref<1x32xf32, #tpu.memory_space<vmem>>, %arg9: memref<1x1xf32, #tpu.memory_space<smem>>, %arg10: memref<8x1xf32, #tpu.memory_space<vmem>>) attributes {dimension_semantics = [#tpu.dimension_semantics<parallel>], iteration_bounds = array<i64: 1>, scalar_prefetch = 0 : i64, scratch_operands = 0 : i64, tpu.core_type = #tpu.core_type<tc>, window_params = [{transform_indices = @transform_0, window_bounds = array<i64: 8, 16>}, {transform_indices = @transform_1, window_bounds = array<i64: 8, 8>}, {pipeline_mode = #tpu.pipeline_mode<synchronous>, transform_indices = @transform_2, window_bounds = array<i64: 16, 32>}, {pipeline_mode = #tpu.pipeline_mode<synchronous>, transform_indices = @transform_3, window_bounds = array<i64: 8, 32>}, {pipeline_mode = #tpu.pipeline_mode<synchronous>, transform_indices = @transform_4, window_bounds = array<i64: 1, 32>}, {pipeline_mode = #tpu.pipeline_mode<synchronous>, transform_indices = @transform_5, window_bounds = array<i64: 32, 32>}, {pipeline_mode = #tpu.pipeline_mode<synchronous>, transform_indices = @transform_6, window_bounds = array<i64: 1, 32>}, {pipeline_mode = #tpu.pipeline_mode<synchronous>, transform_indices = @transform_7, window_bounds = array<i64: 1, 32>}, {transform_indices = @transform_8, window_bounds = array<i64: 1, 1>}, {transform_indices = @transform_9, window_bounds = array<i64: 8, 1>}]} {
    %c0 = arith.constant 0 : index
    %c0_0 = arith.constant 0 : index
    %0 = vector.load %arg1[%c0, %c0_0] : memref<8x16xf32, #tpu.memory_space<vmem>>, vector<8x16xf32>
    %c0_1 = arith.constant 0 : index
    %c0_2 = arith.constant 0 : index
    %1 = vector.load %arg3[%c0_1, %c0_2] : memref<16x32xf32, #tpu.memory_space<vmem>>, vector<16x32xf32>
    %cst = arith.constant dense<0.000000e+00> : vector<8x32xf32>
    %2 = tpu.matmul %0, %1, %cst {dimension_numbers = #tpu.dot_dimension_numbers<[1], [0], [0], [1], [0, 0, 1, 1], [], []>} : vector<8x16xf32>, vector<16x32xf32>, vector<8x32xf32> -> vector<8x32xf32>
    %c0_3 = arith.constant 0 : index
    %c0_4 = arith.constant 0 : index
    %3 = vector.load %arg2[%c0_3, %c0_4] : memref<8x8xf32, #tpu.memory_space<vmem>>, vector<8x8xf32>
    %c0_5 = arith.constant 0 : index
    %c0_6 = arith.constant 0 : index
    %4 = vector.load %arg4[%c0_5, %c0_6] : memref<8x32xf32, #tpu.memory_space<vmem>>, vector<8x32xf32>
    %cst_7 = arith.constant dense<0.000000e+00> : vector<8x32xf32>
    %5 = tpu.matmul %3, %4, %cst_7 {dimension_numbers = #tpu.dot_dimension_numbers<[1], [0], [0], [1], [0, 0, 1, 1], [], []>} : vector<8x8xf32>, vector<8x32xf32>, vector<8x32xf32> -> vector<8x32xf32>
    %6 = arith.addf %2, %5 : vector<8x32xf32>
    %c0_8 = arith.constant 0 : index
    %c0_9 = arith.constant 0 : index
    %7 = vector.load %arg5[%c0_8, %c0_9] : memref<1x32xf32, #tpu.memory_space<vmem>>, vector<1x32xf32>
    %8 = vector.broadcast %7 : vector<1x32xf32> to vector<8x32xf32>
    %9 = arith.addf %6, %8 : vector<8x32xf32>
    %cst_10 = arith.constant 0.000000e+00 : f32
    %10 = vector.broadcast %cst_10 : f32 to vector<8x32xf32>
    %11 = arith.maximumf %9, %10 : vector<8x32xf32>
    %c0_11 = arith.constant 0 : index
    %c0_12 = arith.constant 0 : index
    %12 = vector.load %arg6[%c0_11, %c0_12] : memref<32x32xf32, #tpu.memory_space<vmem>>, vector<32x32xf32>
    %cst_13 = arith.constant dense<0.000000e+00> : vector<8x32xf32>
    %13 = tpu.matmul %11, %12, %cst_13 {dimension_numbers = #tpu.dot_dimension_numbers<[1], [0], [0], [1], [0, 0, 1, 1], [], []>} : vector<8x32xf32>, vector<32x32xf32>, vector<8x32xf32> -> vector<8x32xf32>
    %c0_14 = arith.constant 0 : index
    %c0_15 = arith.constant 0 : index
    %14 = vector.load %arg7[%c0_14, %c0_15] : memref<1x32xf32, #tpu.memory_space<vmem>>, vector<1x32xf32>
    %15 = vector.broadcast %14 : vector<1x32xf32> to vector<8x32xf32>
    %16 = arith.addf %13, %15 : vector<8x32xf32>
    %cst_16 = arith.constant 0.000000e+00 : f32
    %17 = vector.broadcast %cst_16 : f32 to vector<8x32xf32>
    %18 = arith.maximumf %16, %17 : vector<8x32xf32>
    %c0_17 = arith.constant 0 : index
    %c0_18 = arith.constant 0 : index
    %19 = vector.load %arg8[%c0_17, %c0_18] : memref<1x32xf32, #tpu.memory_space<vmem>>, vector<1x32xf32>
    %20 = vector.broadcast %19 : vector<1x32xf32> to vector<8x32xf32>
    %21 = arith.mulf %18, %20 : vector<8x32xf32>
    %cst_19 = arith.constant dense<0.000000e+00> : vector<8xf32>
    %22 = vector.multi_reduction <add>, %21, %cst_19 [1] : vector<8x32xf32> to vector<8xf32>
    %23 = vector.shape_cast %22 : vector<8xf32> to vector<8x1xf32>
    %c0_20 = arith.constant 0 : index
    %c0_21 = arith.constant 0 : index
    %24 = memref.load %arg9[%c0_20, %c0_21] : memref<1x1xf32, #tpu.memory_space<smem>>
    %25 = vector.broadcast %24 : f32 to vector<8x1xf32>
    %26 = arith.addf %23, %25 : vector<8x1xf32>
    %c0_22 = arith.constant 0 : index
    %c0_23 = arith.constant 0 : index
    %27 = vector.load %arg10[%c0_22, %c0_23] : memref<8x1xf32, #tpu.memory_space<vmem>>, vector<8x1xf32>
    tpu.vector_store %arg10[%c0_22, %c0_23], %26 {strides = array<i32>} : memref<8x1xf32, #tpu.memory_space<vmem>>, vector<8x1xf32>,
    return
  }
  func.func @transform_0(%arg0: i32) -> (i32, i32) {
    %c0_i32 = arith.constant 0 : i32
    %c0_i32_0 = arith.constant 0 : i32
    return %arg0, %c0_i32 : i32, i32
  }
  func.func @transform_1(%arg0: i32) -> (i32, i32) {
    %c0_i32 = arith.constant 0 : i32
    %c0_i32_0 = arith.constant 0 : i32
    return %arg0, %c0_i32 : i32, i32
  }
  func.func @transform_2(%arg0: i32) -> (i32, i32) {
    %c0_i32 = arith.constant 0 : i32
    %c0_i32_0 = arith.constant 0 : i32
    %c0_i32_1 = arith.constant 0 : i32
    return %c0_i32, %c0_i32_0 : i32, i32
  }
  func.func @transform_3(%arg0: i32) -> (i32, i32) {
    %c0_i32 = arith.constant 0 : i32
    %c0_i32_0 = arith.constant 0 : i32
    %c0_i32_1 = arith.constant 0 : i32
    return %c0_i32, %c0_i32_0 : i32, i32
  }
  func.func @transform_4(%arg0: i32) -> (i32, i32) {
    %c0_i32 = arith.constant 0 : i32
    %c0_i32_0 = arith.constant 0 : i32
    %c0_i32_1 = arith.constant 0 : i32
    return %c0_i32, %c0_i32_0 : i32, i32
  }
  func.func @transform_5(%arg0: i32) -> (i32, i32) {
    %c0_i32 = arith.constant 0 : i32
    %c0_i32_0 = arith.constant 0 : i32
    %c0_i32_1 = arith.constant 0 : i32
    return %c0_i32, %c0_i32_0 : i32, i32
  }
  func.func @transform_6(%arg0: i32) -> (i32, i32) {
    %c0_i32 = arith.constant 0 : i32
    %c0_i32_0 = arith.constant 0 : i32
    %c0_i32_1 = arith.constant 0 : i32
    return %c0_i32, %c0_i32_0 : i32, i32
  }
  func.func @transform_7(%arg0: i32) -> (i32, i32) {
    %c0_i32 = arith.constant 0 : i32
    %c0_i32_0 = arith.constant 0 : i32
    %c0_i32_1 = arith.constant 0 : i32
    return %c0_i32, %c0_i32_0 : i32, i32
  }
  func.func @transform_8(%arg0: i32) -> (i32, i32) {
    %c0_i32 = arith.constant 0 : i32
    %c0_i32_0 = arith.constant 0 : i32
    %c0_i32_1 = arith.constant 0 : i32
    return %c0_i32, %c0_i32_0 : i32, i32
  }
  func.func @transform_9(%arg0: i32) -> (i32, i32) {
    %c0_i32 = arith.constant 0 : i32
    %c0_i32_0 = arith.constant 0 : i32
    return %arg0, %c0_i32 : i32, i32
  }
}

</mosaic_0001>

<bundles_post_ra>
// kernel: tpu_custom_call.1
= control target key start
LH: loop header
LB: loop body
LE: loop exit
PB: predicated region body
PF: predicated region fallthrough
CT: control target
= control target key end

     0   :  { %15 = vsyncpa [#allocation4], 0  ;;  %s609_s0 = inlined_call_operand.hbm [shape: f32[8,16], index: 0, kind: input, shape index: {}]   ;;  %s610_s1 = inlined_call_operand.hbm [shape: f32[8,8], index: 1, kind: input, shape index: {}]   ;;  %s611_s2 = inlined_call_operand.hbm [shape: f32[16,32], index: 2, kind: input, shape index: {}]   ;;  %s612_s3 = inlined_call_operand.hbm [shape: f32[8,32], index: 3, kind: input, shape index: {}]   ;;  %s613_s4 = inlined_call_operand.vmem [shape: f32[1,32], index: 4, kind: input, shape index: {}]   ;;  %s614_s5 = inlined_call_operand.hbm [shape: f32[32,32], index: 5, kind: input, shape index: {}]   ;;  %s615_s6 = inlined_call_operand.vmem [shape: f32[1,32], index: 6, kind: input, shape index: {}]   ;;  %s616_s7 = inlined_call_operand.vmem [shape: f32[1,32], index: 7, kind: input, shape index: {}]   ;;  %s617_s8 = inlined_call_operand.<no memory space> [shape: f32[1,1], index: 8, kind: input, shape index: {}]   ;;  %s618_s9 = inlined_call_operand.vmem [shape: f32[8,1], index: 9, kind: output, shape index: {}]  }
   0x1   :  { %16 = vsyncpa [#allocation6], 0 }
   0x2   :  { %17 = vsyncpa [#allocation9], 0  ;;  %s520_s30 = smov [#allocation5]   ;;  %s521_s11 = smov [#allocation8]  }
   0x3   :  { %s34_s10 = sshll.u32 %s520_s30, 4  ;;  %s56_s12 = sshll.u32 %s521_s11, 4  ;;  %s35_s10 = int_to_ptr.vmem [resolvable:$true] %s34_s10  ;;  %s57_s12 = int_to_ptr.vmem [resolvable:$true] %s56_s12 }
   0x4   :  { %s422_s13 = scalar_lea.vmem %s35_s10, 128  ;;  %p427_p1 = scmp.lt.s32.totalorder %s35_s10, %s35_s10 }
   0x5   :  { %p423_p0 = scmp.ne.s32.totalorder %s35_s10, %s422_s13  ;;  %p428_p2 = scmp.lt.s32.totalorder %s422_s13, %s422_s13 }
   0x7   :  { %p429_p3 = por %p428_p2, %p427_p1 }
   0x9   :  { %p430_p4 = pnand %p429_p3, %p423_p0 }
   0xb   :  { %433 = shalt.err (!%p430_p4)
}
   0xc   :  { %37 = dma.hbm_to_vmem [thread:$0]  %s610_s1, 128, %s35_s10, [#allocation6]  }
   0xd   :  { %s442_s16 = scalar_lea.vmem %s57_s12, 128  ;;  %p447_p6 = scmp.lt.s32.totalorder %s57_s12, %s57_s12 }
   0xe   :  { %p443_p5 = scmp.ne.s32.totalorder %s57_s12, %s442_s16  ;;  %p448_p7 = scmp.lt.s32.totalorder %s442_s16, %s442_s16 }
  0x10   :  { %p449_p8 = por %p448_p7, %p447_p6 }
  0x12   :  { %p450_p9 = pnand %p449_p8, %p443_p5 }
  0x14   :  { %453 = shalt.err (!%p450_p9)
}
  0x15   :  { %59 = dma.hbm_to_vmem [thread:$0]  %s612_s3, 128, %s57_s12, [#allocation9]  }
  0x16   :  { %s522_s19 = smov [#allocation3]   ;;  %s523_s21 = smov [#allocation7]  }
  0x17   :  { %s24_s20 = sshll.u32 %s522_s19, 4  ;;  %s43_s22 = sshll.u32 %s523_s21, 4  ;;  %s25_s20 = int_to_ptr.vmem [resolvable:$true] %s24_s20  ;;  %s44_s22 = int_to_ptr.vmem [resolvable:$true] %s43_s22 }
  0x18   :  { %s462_s23 = scalar_lea.vmem %s25_s20, 128  ;;  %p467_p11 = scmp.lt.s32.totalorder %s25_s20, %s25_s20 }
  0x19   :  { %p463_p10 = scmp.ne.s32.totalorder %s25_s20, %s462_s23  ;;  %p468_p12 = scmp.lt.s32.totalorder %s462_s23, %s462_s23 }
  0x1b   :  { %p469_p13 = por %p468_p12, %p467_p11 }
  0x1d   :  { %p470_p0 = pnand %p469_p13, %p463_p10 }
  0x1f   :  { %473 = shalt.err (!%p470_p0)
}
  0x20   :  { %27 = dma.hbm_to_vmem [thread:$0]  %s609_s0, 128, %s25_s20, [#allocation4]  }
  0x21   :  { %s482_s25 = scalar_lea.vmem %s44_s22, 256  ;;  %p487_p2 = scmp.lt.s32.totalorder %s44_s22, %s44_s22 }
  0x22   :  { %p483_p1 = scmp.ne.s32.totalorder %s44_s22, %s482_s25  ;;  %p488_p3 = scmp.lt.s32.totalorder %s482_s25, %s482_s25 }
  0x24   :  { %p489_p4 = por %p488_p3, %p487_p2 }
  0x26   :  { %p490_p5 = pnand %p489_p4, %p483_p1 }
  0x28   :  { %493 = shalt.err (!%p490_p5)
}
  0x29   :  { %s524_s3 = smov 128   ;;  %s525_s26 = smov 8  }
  0x2a   :  { %49 = dma.hbm_to_vmem [thread:$0]  %s611_s2, 256, %s44_s22, [#allocation6], %s524_s3, %s524_s3, %s525_s26  }
  0x2b   :  { %s526_s29 = smov [#allocation10]  }
  0x2c   :  { %s67_s30 = sshll.u32 %s526_s29, 4  ;;  %s68_s30 = int_to_ptr.vmem [resolvable:$true] %s67_s30 }
  0x2d   :  { %s502_s10 = scalar_lea.vmem %s68_s30, 512  ;;  %p507_p7 = scmp.lt.s32.totalorder %s68_s30, %s68_s30 }
  0x2e   :  { %p503_p6 = scmp.ne.s32.totalorder %s68_s30, %s502_s10  ;;  %p508_p8 = scmp.lt.s32.totalorder %s502_s10, %s502_s10 }
  0x30   :  { %p509_p9 = por %p508_p8, %p507_p7 }
  0x32   :  { %p510_p10 = pnand %p509_p9, %p503_p6 }
  0x34   :  { %513 = shalt.err (!%p510_p10)
}
  0x35   :  { %73 = dma.hbm_to_vmem [thread:$0]  %s614_s5, 512, %s68_s30, [#allocation9], %s524_s3, %s524_s3, %s525_s26  }
  0x36   :  { %514 = dma.done.wait [#allocation4], 128  }
  0x37   :  { %515 = vsyncadd [#allocation4], 4294967168 }
  0x38   :  { %516 = dma.done.wait [#allocation6], 384  }
  0x39   :  { %517 = vsyncadd [#allocation6], 4294966912 }
  0x3a   :  { %518 = dma.done.wait [#allocation9], 640  }
  0x3b   :  { %519 = vsyncadd [#allocation9], 4294966656  ;;  %v527_v0 = vmov 0.0   ;;  %vm528_vm0 = vmmov 0   ;;  %vm100_vm1 = vcmask 64512   ;;  %v99_v1 = vld [vmem:[#allocation8] sm:$0xff]  ;;  %v355_v26 = vstv %s617_s8 }
  0x3c   :  { %382 = vmatprep.subr.mxu1 %v527_v0  ;;  %384 = vmatprep.mubr.msk.f32.mxu1 %vm528_vm0, %v527_v0  ;;  %v98_v2 = vld [vmem:[#allocation5] sm:$0xff]  ;;  %v97_v3 = vld [vmem:[#allocation7 + $0x8] sm:$0xff]  ;;  %v96_v4 = vld [vmem:[#allocation7] sm:$0xff]  ;;  %vm174_vm2 = vcmask 130048   ;;  %vm268_vm3 = vcmask 261120   ;;  %vm357_vm4 = vcmask 7168  }
  0x3d   :  { %394 = vmatprep.subr.mxu0 %v527_v0  ;;  %402 = vmatprep.mubr.msk.f32.mxu0 %vm528_vm0, %v527_v0  ;;  %v95_v5 = vld [vmem:[#allocation3] sm:$0xff]  ;;  %v259_v7 = vld [vmem:[#allocation10 + $0x10] sm:$0xff]  ;;  %v258_v8 = vld [vmem:[#allocation10 + $0x8] sm:$0xff] }
  0x3e   :  { %383 = vmatpush3.msra.mxu1 %v99_v1  ;;  %v260_v6 = vld [vmem:[#allocation10 + $0x18] sm:$0xff]  ;;  %v257_v9 = vld [vmem:[#allocation10] sm:$0xff] }
  0x3f   :  { %385 = vmatmul.mubr.msk.f32.vlgmr.msra.gmra.mxu1 %vm100_vm1, %v98_v2  ;;  %387 = vmatprep.subr.mxu1 %v527_v0  ;;  %v368_v13 = vld [vmem:[%s613_s4] ss:$0 sm:$0xff] }
  0x40   :  { %388 = vmatpush3.msra.mxu1 %v97_v3  ;;  %391 = vmatprep.mubr.msk.f32.mxu1 %vm528_vm0, %v527_v0  ;;  %v369_v18 = vld [vmem:[%s615_s6] ss:$0 sm:$0xff] }
  0x41   :  { %389 = vmatprep.subr.mxu1 %v527_v0  ;;  %395 = vmatpush3.msra.mxu0 %v260_v6  ;;  %v371_v22 = vld [vmem:[%s616_s7] ss:$0 sm:$0xff] }
  0x42   :  { %390 = vmatpush3.msra.mxu1 %v96_v4  ;;  %396 = vmatprep.subr.mxu0 %v527_v0 }
  0x43   :  { %392 = vmatmul.mubr.msk.f32.vlgmr.msra.gmra.mxu1 %vm174_vm2, %v95_v5  ;;  %397 = vmatpush3.msra.mxu0 %v259_v7 }
  0x44   :  { %398 = vmatprep.subr.mxu0 %v527_v0 }
  0x45   :  { %399 = vmatpush3.msra.mxu0 %v258_v8 }
  0x46   :  { %400 = vmatprep.subr.mxu0 %v527_v0 }
  0x47   :  { %401 = vmatpush3.msra.mxu0 %v257_v9 }
  0xff   :  { %v170_v10 = vpop.f32.mrf.mxu1 }
 0x101   :  { %v386_v11 = vpop.f32.mrf.mxu1 }
 0x103   :  { %v244_v12 = vpop.f32.mrf.mxu1 }
 0x104   :  { %v245_v14 = vadd.f32 %v244_v12, %v170_v10 }
 0x105   :  { %v393_v15 = vpop.f32.mrf.mxu1 }
 0x106   :  { %v255_v16 = vadd.f32 %v368_v13, %v245_v14 }
 0x108   :  { %v256_v17 = vmax.f32 %v255_v16, 0.0 }
 0x10a   :  { %403 = vmatmul.mubr.msk.f32.vlgmr.msra.gmra.mxu0 %vm268_vm3, %v256_v17 }
 0x1ca   :  { %v338_v19 = vpop.f32.mrf.mxu0 }
 0x1cb   :  { %v339_v20 = vadd.f32 %v369_v18, %v338_v19 }
 0x1cc   :  { %v404_v21 = vpop.f32.mrf.mxu0 }
 0x1cd   :  { %v342_v23 = vmax.f32 %v339_v20, 0.0 }
 0x1cf   :  { %v350_v24 = vmul.f32 %v371_v22, %v342_v23 }
 0x1d1   :  { %v351_v25 = vsel %vm268_vm3, %v350_v24, 0.0 }
 0x1d2   :  { %352 = vadd.xlane.f32.xlu0 %v351_v25 }
 0x25b   :  { %v353_v27 = vpop.xlane.xlu0 %352 }
 0x25c   :  { %v356_v28 = vadd.f32 %v355_v26, %v353_v27 }
 0x25e   :  { %358 = vst.msk [vmem:[%s618_s9] sm:$0xff] %vm357_vm4, %v356_v28 }
 0x25f   :  { %363 = vsyncpa [#allocation4], 1 }
 0x260   :  { %364 = vsyncpa [#allocation6], 1 }
 0x261   :  { %365 = vsyncpa [#allocation9], 1 }

</bundles_post_ra>
